<compile_context>
chip_gen: v5e
topology: v5e:2x2
jax: 0.10.0
libtpu: 0.0.40
codegen_flags: <defaults>
</compile_context>

<pallas_src>
import numpy as np
import jax
import jax.numpy as jnp
from jax.experimental import pallas as pl
from jax.experimental.pallas import tpu as pltpu


def make_sinusoid_table(n_position: int, d_hid: int) -> jnp.ndarray:
    """Deterministic sinusoid position encoding table, shape (n_position, d_hid), f32."""
    pos = np.arange(n_position, dtype=np.float64)[:, None]            # (P, 1)
    hid = np.arange(d_hid, dtype=np.int64)[None, :]                   # (1, D)
    angle = pos / np.power(10000.0, 2.0 * (hid // 2) / float(d_hid))  # (P, D)
    table = np.empty_like(angle)
    table[:, 0::2] = np.sin(angle[:, 0::2])
    table[:, 1::2] = np.cos(angle[:, 1::2])
    return jnp.asarray(table, dtype=jnp.float32)


def _add_pos_kernel(x_ref, pos_ref, o_ref):
    # x_ref: (TB, TC) tile of the flattened activations
    # pos_ref: (1, TC) tile of the flattened positional table (broadcast over TB)
    o_ref[...] = x_ref[...] + pos_ref[...]


def _pick_col_tile(total_cols: int, tb: int, itemsize: int,
                   target_bytes: int = 1 << 20) -> int:
    """Largest multiple of 128 dividing total_cols whose x-tile fits target_bytes."""
    if total_cols % 128 != 0:
        # Lane dim equal to the full array dim is always legal.
        return total_cols
    cands = [c for c in range(128, total_cols + 1, 128) if total_cols % c == 0]
    fitting = [c for c in cands if tb * c * itemsize <= target_bytes]
    return max(fitting) if fitting else min(cands)


def positional_encoding(x: jnp.ndarray, pos_table: jnp.ndarray) -> jnp.ndarray:
    """x: (B, S, D); pos_table: (n_position, D). Returns x + pos_table[:S] broadcast over B."""
    B, S, D = x.shape
    cols = S * D
    itemsize = jnp.dtype(x.dtype).itemsize

    # Glue (outside the hot loop): slice to sequence length and flatten lane-dense.
    pos2 = pos_table[:S, :].astype(x.dtype).reshape(1, cols)   # (1, S*D)
    x2 = x.reshape(B, cols)                                    # (B, S*D)

    # Batch tile: multiple of 8 sublanes when possible, else the full batch dim.
    tb = 8 if (B >= 8 and B % 8 == 0) else B
    tc = _pick_col_tile(cols, tb, itemsize)

    # Outer axis = column tiles, inner axis = batch tiles -> the pos block index
    # (which depends only on the column index) is constant across the inner loop,
    # so the pos slab is DMA'd from HBM exactly once per column tile.
    grid = (cols // tc, B // tb)

    out2 = pl.pallas_call(
        _add_pos_kernel,
        out_shape=jax.ShapeDtypeStruct((B, cols), x.dtype),
        grid=grid,
        in_specs=[
            pl.BlockSpec((tb, tc), lambda c, b: (b, c)),   # x tile
            pl.BlockSpec((1, tc), lambda c, b: (0, c)),    # shared pos tile (resident)
        ],
        out_specs=pl.BlockSpec((tb, tc), lambda c, b: (b, c)),
        compiler_params=pltpu.CompilerParams(
            dimension_semantics=("parallel", "parallel"),
            vmem_limit_bytes=32 * 1024 * 1024,
        ),
    )(x2, pos2)

    return out2.reshape(B, S, D)


if __name__ == "__main__":
    B, S, D = 2, 8, 32
    n_position = 600

    key = jax.random.PRNGKey(0)
    x = jax.random.normal(key, (B, S, D), dtype=jnp.float32)

    pos_table = make_sinusoid_table(n_position, D)

    out = positional_encoding(x, pos_table)
    out = jax.block_until_ready(out)

    # correctness check against plain-JAX reference
    ref = x + pos_table[None, :S, :]
    assert out.shape == (B, S, D)
    assert jnp.allclose(out, ref, atol=1e-6), "mismatch vs reference"

    print("KERNEL_OK")
</pallas_src>

<mosaic_0001>
module attributes {stable_mosaic.version = 11 : i64} {
  func.func @_add_pos_kernel(%arg0: i32, %arg1: i32, %arg2: memref<2x256xf32, #tpu.memory_space<vmem>>, %arg3: memref<1x256xf32, #tpu.memory_space<vmem>>, %arg4: memref<2x256xf32, #tpu.memory_space<vmem>>) attributes {dimension_semantics = [#tpu.dimension_semantics<parallel>, #tpu.dimension_semantics<parallel>], iteration_bounds = array<i64: 1, 1>, scalar_prefetch = 0 : i64, scratch_operands = 0 : i64, tpu.core_type = #tpu.core_type<tc>, window_params = [{transform_indices = @transform_0, window_bounds = array<i64: 2, 256>}, {transform_indices = @transform_1, window_bounds = array<i64: 1, 256>}, {transform_indices = @transform_2, window_bounds = array<i64: 2, 256>}]} {
    %c0 = arith.constant 0 : index
    %c0_0 = arith.constant 0 : index
    %0 = vector.load %arg2[%c0, %c0_0] : memref<2x256xf32, #tpu.memory_space<vmem>>, vector<2x256xf32>
    %c0_1 = arith.constant 0 : index
    %c0_2 = arith.constant 0 : index
    %1 = vector.load %arg3[%c0_1, %c0_2] : memref<1x256xf32, #tpu.memory_space<vmem>>, vector<1x256xf32>
    %2 = vector.broadcast %1 : vector<1x256xf32> to vector<2x256xf32>
    %3 = arith.addf %0, %2 : vector<2x256xf32>
    %c0_3 = arith.constant 0 : index
    %c0_4 = arith.constant 0 : index
    %4 = vector.load %arg4[%c0_3, %c0_4] : memref<2x256xf32, #tpu.memory_space<vmem>>, vector<2x256xf32>
    tpu.vector_store %arg4[%c0_3, %c0_4], %3 {strides = array<i32>} : memref<2x256xf32, #tpu.memory_space<vmem>>, vector<2x256xf32>,
    return
  }
  func.func @transform_0(%arg0: i32, %arg1: i32) -> (i32, i32) {
    %c0_i32 = arith.constant 0 : i32
    return %arg1, %arg0 : i32, i32
  }
  func.func @transform_1(%arg0: i32, %arg1: i32) -> (i32, i32) {
    %c0_i32 = arith.constant 0 : i32
    %c0_i32_0 = arith.constant 0 : i32
    return %c0_i32, %arg0 : i32, i32
  }
  func.func @transform_2(%arg0: i32, %arg1: i32) -> (i32, i32) {
    %c0_i32 = arith.constant 0 : i32
    return %arg1, %arg0 : i32, i32
  }
}

</mosaic_0001>

<bundles_post_ra>
// kernel: tpu_custom_call.1
= control target key start
LH: loop header
LB: loop body
LE: loop exit
PB: predicated region body
PF: predicated region fallthrough
CT: control target
= control target key end

     0   :  { %7 = vsyncpa [#allocation3], 0  ;;  %s177_s0 = inlined_call_operand.hbm [shape: f32[2,256], index: 0, kind: input, shape index: {}]   ;;  %s178_s1 = inlined_call_operand.hbm [shape: f32[1,256], index: 1, kind: input, shape index: {}]   ;;  %s179_s2 = inlined_call_operand.hbm [shape: f32[2,256], index: 2, kind: output, shape index: {}]  }
   0x1   :  { %8 = vsyncpa [#allocation6], 0 }
   0x2   :  { %9 = vsyncpa [#allocation4], 0  ;;  %s15_s11 = sshll.u32 %s177_s0, 4  ;;  %s150_s12 = smov [#allocation2]   ;;  %s16_s11 = int_to_ptr.hbm [resolvable:$true] %s15_s11 }
   0x3   :  { %s17_s13 = sshll.u32 %s150_s12, 4  ;;  %s26_s16 = sshll.u32 %s178_s1, 4  ;;  %s18_s13 = int_to_ptr.vmem [resolvable:$true] %s17_s13  ;;  %s27_s16 = int_to_ptr.hbm [resolvable:$true] %s26_s16 }
   0x4   :  { %20 = dma.hbm_to_vmem [thread:$0]  %s16_s11, 64, %s18_s13, [#allocation3]  }
   0x5   :  { %s151_s17 = smov [#allocation5]  }
   0x6   :  { %s28_s18 = sshll.u32 %s151_s17, 4  ;;  %s29_s18 = int_to_ptr.vmem [resolvable:$true] %s28_s18 }
   0x7   :  { %31 = dma.hbm_to_vmem [thread:$0]  %s27_s16, 32, %s29_s18, [#allocation6]  }
   0x8   :  { %144 = dma.done.wait [#allocation3], 64  }
   0x9   :  { %145 = vsyncadd [#allocation3], 4294967232 }
   0xa   :  { %146 = dma.done.wait [#allocation6], 32  }
   0xb   :  { %147 = vsyncadd [#allocation6], 4294967264  ;;  %v41_v0 = vld [vmem:[#allocation5] sm:$0x3]  ;;  %vm46_vm0 = vcmask 1041408   ;;  %s152_s0 = smov [#allocation7]  }
   0xc   :  { %v43_v1 = vperm.slane %v41_v0, 0  ;;  %v44_v2 = vperm.slane %v41_v0, 1  ;;  %v40_v3 = vld [vmem:[#allocation2] sm:$0xf]  ;;  %s56_s19 = sshll.u32 %s152_s0, 4  ;;  %s58_s21 = sshll.u32 %s179_s2, 4  ;;  %s57_s19 = int_to_ptr.vmem [resolvable:$true] %s56_s19  ;;  %s59_s21 = int_to_ptr.hbm [resolvable:$true] %s58_s21 }
   0xe   :  { %v45_v4 = vrot.slane %v44_v2, 6 }
  0x10   :  { %v47_v5 = vsel %vm46_vm0, %v43_v1, %v45_v4 }
  0x11   :  { %v49_v6 = vadd.f32 %v47_v5, %v40_v3 }
  0x13   :  { %50 = vst [vmem:[#allocation7] sm:$0xf] %v49_v6 }
  0x14   :  { %61 = dma.vmem_to_hbm [thread:$0]  %s57_s19, 64, %s59_s21, [#allocation4]  }
  0x15   :  { %148 = dma.done.wait [#allocation4], 64  }
  0x16   :  { %149 = vsyncadd [#allocation4], 4294967232 }
  0x17   :  { %66 = vsyncpa [#allocation3], 1 }
  0x18   :  { %67 = vsyncpa [#allocation6], 1 }
  0x19   :  { %68 = vsyncpa [#allocation4], 1 }

</bundles_post_ra>
